<compile_context>
chip_gen: v5e
topology: v5e:2x2
jax: 0.10.0
libtpu: 0.0.40
codegen_flags: <defaults>
</compile_context>

<pallas_src>
import functools

import jax
import jax.numpy as jnp
from jax.experimental import pallas as pl
from jax.experimental.pallas import tpu as pltpu


def _iou_loss_body(boxes, loss_type):
    # boxes: (8, TILE_N) f32 -> per-lane loss (1, TILE_N) f32
    p_xy, p_wh = boxes[0:2, :], boxes[2:4, :]
    t_xy, t_wh = boxes[4:6, :], boxes[6:8, :]

    p_half = p_wh * 0.5
    t_half = t_wh * 0.5

    tl = jnp.maximum(p_xy - p_half, t_xy - t_half)
    br = jnp.minimum(p_xy + p_half, t_xy + t_half)

    area_p = p_wh[0:1, :] * p_wh[1:2, :]
    area_g = t_wh[0:1, :] * t_wh[1:2, :]

    d = br - tl
    dx, dy = d[0:1, :], d[1:2, :]
    # en = prod(tl < br, axis=0)  <=>  (dx > 0) & (dy > 0)  (lane-wise, no XLU reduce)
    valid = jnp.logical_and(dx > 0.0, dy > 0.0)
    area_i = jnp.where(valid, dx * dy, 0.0)
    iou = area_i / (area_p + area_g - area_i + 1e-16)

    if loss_type == "iou":
        loss = 1.0 - iou * iou
    elif loss_type == "giou":
        c_tl = jnp.minimum(p_xy - p_half, t_xy - t_half)
        c_br = jnp.maximum(p_xy + p_half, t_xy + t_half)
        cd = c_br - c_tl
        area_c = cd[0:1, :] * cd[1:2, :]
        giou = iou - (area_c - area_i) / jnp.maximum(area_c, 1e-16)
        loss = 1.0 - jnp.clip(giou, -1.0, 1.0)
    else:
        raise ValueError(f"unknown loss_type: {loss_type}")
    return loss


def _iou_loss_none_kernel(boxes_ref, loss_ref, *, loss_type):
    loss_ref[...] = _iou_loss_body(boxes_ref[...], loss_type)


def _iou_loss_reduce_kernel(n_ref, boxes_ref, acc_ref, *, loss_type, tile_n):
    i = pl.program_id(0)

    @pl.when(i == 0)
    def _():
        acc_ref[...] = jnp.zeros_like(acc_ref)

    loss = _iou_loss_body(boxes_ref[...], loss_type)
    # mask the padded lanes so they don't pollute the sum
    idx = i * tile_n + jax.lax.broadcasted_iota(jnp.int32, loss.shape, 1)
    loss = jnp.where(idx < n_ref[0], loss, 0.0)
    acc_ref[...] += jnp.sum(loss, keepdims=True)


def iou_loss(pred, target, *, reduction="none", loss_type="iou", max_tile=32768):
    """Pallas implementation of IOUloss.forward (cx,cy,w,h boxes)."""
    assert pred.shape[0] == target.shape[0]
    pred = pred.reshape(-1, 4).astype(jnp.float32)
    target = target.reshape(-1, 4).astype(jnp.float32)
    n = pred.shape[0]

    # lane tile: multiple of 128, as large as possible (capped by max_tile)
    n128 = ((n + 127) // 128) * 128
    tile_n = min(n128, max_tile)
    tile_n = ((tile_n + 127) // 128) * 128
    n_pad = ((n + tile_n - 1) // tile_n) * tile_n
    grid = n_pad // tile_n

    # single fused SoA pack: (n,4)+(n,4) -> (n,8) -> (8,n) -> pad lanes to n_pad
    boxes = jnp.concatenate([pred, target], axis=1).T
    if n_pad > n:
        boxes = jax.lax.pad(boxes, jnp.float32(0.0), [(0, 0, 0), (0, n_pad - n, 0)])

    if reduction == "none":
        kernel = functools.partial(_iou_loss_none_kernel, loss_type=loss_type)
        loss2d = pl.pallas_call(
            kernel,
            out_shape=jax.ShapeDtypeStruct((1, n_pad), jnp.float32),
            grid_spec=pltpu.PrefetchScalarGridSpec(
                num_scalar_prefetch=0,
                grid=(grid,),
                in_specs=[pl.BlockSpec((8, tile_n), lambda i: (0, i))],
                out_specs=pl.BlockSpec((1, tile_n), lambda i: (0, i)),
            ),
            compiler_params=pltpu.CompilerParams(
                dimension_semantics=("parallel",)),
        )(boxes)
        return loss2d[0, :n]

    # reduction == 'sum' or 'mean': in-kernel accumulation, padded lanes masked
    kernel = functools.partial(
        _iou_loss_reduce_kernel, loss_type=loss_type, tile_n=tile_n)
    n_arr = jnp.array([n], jnp.int32)
    acc = pl.pallas_call(
        kernel,
        out_shape=jax.ShapeDtypeStruct((1, 1), jnp.float32),
        grid_spec=pltpu.PrefetchScalarGridSpec(
            num_scalar_prefetch=1,
            grid=(grid,),
            in_specs=[pl.BlockSpec((8, tile_n), lambda i, n_ref: (0, i))],
            out_specs=pl.BlockSpec((1, 1), lambda i, n_ref: (0, 0)),
        ),
        compiler_params=pltpu.CompilerParams(
            dimension_semantics=("arbitrary",)),
    )(n_arr, boxes)
    total = acc[0, 0]
    if reduction == "mean":
        return total / jnp.float32(n)
    return total


def _iou_loss_ref(pred, target, reduction="none", loss_type="iou"):
    """Pure-JAX reference (mirrors the PyTorch code)."""
    pred = pred.reshape(-1, 4).astype(jnp.float32)
    target = target.reshape(-1, 4).astype(jnp.float32)
    tl = jnp.maximum(pred[:, :2] - pred[:, 2:] / 2, target[:, :2] - target[:, 2:] / 2)
    br = jnp.minimum(pred[:, :2] + pred[:, 2:] / 2, target[:, :2] + target[:, 2:] / 2)
    area_p = jnp.prod(pred[:, 2:], 1)
    area_g = jnp.prod(target[:, 2:], 1)
    en = jnp.prod((tl < br).astype(tl.dtype), axis=1)
    area_i = jnp.prod(br - tl, 1) * en
    iou = area_i / (area_p + area_g - area_i + 1e-16)
    if loss_type == "iou":
        loss = 1 - iou ** 2
    else:
        c_tl = jnp.minimum(pred[:, :2] - pred[:, 2:] / 2, target[:, :2] - target[:, 2:] / 2)
        c_br = jnp.maximum(pred[:, :2] + pred[:, 2:] / 2, target[:, :2] + target[:, 2:] / 2)
        area_c = jnp.prod(c_br - c_tl, 1)
        giou = iou - (area_c - area_i) / jnp.maximum(area_c, 1e-16)
        loss = 1 - jnp.clip(giou, -1.0, 1.0)
    if reduction == "mean":
        loss = loss.mean()
    elif reduction == "sum":
        loss = loss.sum()
    return loss


if __name__ == "__main__":
    key = jax.random.PRNGKey(0)
    k1, k2, k3, k4 = jax.random.split(key, 4)

    N = 300  # number of boxes; not a multiple of 128 to exercise padding/masking
    pred = jnp.concatenate(
        [jax.random.uniform(k1, (N, 2), jnp.float32, 0.0, 16.0),
         jax.random.uniform(k2, (N, 2), jnp.float32, 1.0, 8.0)], axis=1)
    target = jnp.concatenate(
        [jax.random.uniform(k3, (N, 2), jnp.float32, 0.0, 16.0),
         jax.random.uniform(k4, (N, 2), jnp.float32, 1.0, 8.0)], axis=1)

    # elementwise (reduction='none'), both loss types
    out = jax.block_until_ready(iou_loss(pred, target, reduction="none", loss_type="iou"))
    ref = _iou_loss_ref(pred, target, reduction="none", loss_type="iou")
    assert out.shape == (N,)
    assert jnp.allclose(out, ref, atol=1e-5, rtol=1e-5)

    out_g = jax.block_until_ready(iou_loss(pred, target, loss_type="giou"))
    ref_g = _iou_loss_ref(pred, target, loss_type="giou")
    assert jnp.allclose(out_g, ref_g, atol=1e-5, rtol=1e-5)

    # in-kernel reductions; max_tile=128 forces a multi-step accumulator grid
    out_s = jax.block_until_ready(
        iou_loss(pred, target, reduction="sum", loss_type="iou", max_tile=128))
    ref_s = _iou_loss_ref(pred, target, reduction="sum", loss_type="iou")
    assert jnp.allclose(out_s, ref_s, atol=1e-3, rtol=1e-4)

    out_m = jax.block_until_ready(
        iou_loss(pred, target, reduction="mean", loss_type="giou"))
    ref_m = _iou_loss_ref(pred, target, reduction="mean", loss_type="giou")
    assert jnp.allclose(out_m, ref_m, atol=1e-5, rtol=1e-4)

    print("KERNEL_OK")
</pallas_src>

<mosaic_0001>
module attributes {stable_mosaic.version = 11 : i64} {
  func.func @_iou_loss_none_kernel(%arg0: i32, %arg1: memref<8x384xf32, #tpu.memory_space<vmem>>, %arg2: memref<1x384xf32, #tpu.memory_space<vmem>>) attributes {dimension_semantics = [#tpu.dimension_semantics<parallel>], iteration_bounds = array<i64: 1>, scalar_prefetch = 0 : i64, scratch_operands = 0 : i64, tpu.core_type = #tpu.core_type<tc>, window_params = [{transform_indices = @transform_0, window_bounds = array<i64: 8, 384>}, {transform_indices = @transform_1, window_bounds = array<i64: 1, 384>}]} {
    %c0 = arith.constant 0 : index
    %c0_0 = arith.constant 0 : index
    %0 = vector.load %arg1[%c0, %c0_0] : memref<8x384xf32, #tpu.memory_space<vmem>>, vector<8x384xf32>
    %1 = vector.extract_strided_slice %0 {offsets = [0, 0], sizes = [2, 384], strides = [1, 1]} : vector<8x384xf32> to vector<2x384xf32>
    %2 = vector.extract_strided_slice %0 {offsets = [2, 0], sizes = [2, 384], strides = [1, 1]} : vector<8x384xf32> to vector<2x384xf32>
    %3 = vector.extract_strided_slice %0 {offsets = [4, 0], sizes = [2, 384], strides = [1, 1]} : vector<8x384xf32> to vector<2x384xf32>
    %4 = vector.extract_strided_slice %0 {offsets = [6, 0], sizes = [2, 384], strides = [1, 1]} : vector<8x384xf32> to vector<2x384xf32>
    %cst = arith.constant 5.000000e-01 : f32
    %5 = vector.broadcast %cst : f32 to vector<2x384xf32>
    %6 = arith.mulf %2, %5 : vector<2x384xf32>
    %cst_1 = arith.constant 5.000000e-01 : f32
    %7 = vector.broadcast %cst_1 : f32 to vector<2x384xf32>
    %8 = arith.mulf %4, %7 : vector<2x384xf32>
    %9 = arith.subf %1, %6 : vector<2x384xf32>
    %10 = arith.subf %3, %8 : vector<2x384xf32>
    %11 = arith.maximumf %9, %10 : vector<2x384xf32>
    %12 = arith.addf %1, %6 : vector<2x384xf32>
    %13 = arith.addf %3, %8 : vector<2x384xf32>
    %14 = arith.minimumf %12, %13 : vector<2x384xf32>
    %15 = vector.extract_strided_slice %2 {offsets = [0, 0], sizes = [1, 384], strides = [1, 1]} : vector<2x384xf32> to vector<1x384xf32>
    %16 = vector.extract_strided_slice %2 {offsets = [1, 0], sizes = [1, 384], strides = [1, 1]} : vector<2x384xf32> to vector<1x384xf32>
    %17 = arith.mulf %15, %16 : vector<1x384xf32>
    %18 = vector.extract_strided_slice %4 {offsets = [0, 0], sizes = [1, 384], strides = [1, 1]} : vector<2x384xf32> to vector<1x384xf32>
    %19 = vector.extract_strided_slice %4 {offsets = [1, 0], sizes = [1, 384], strides = [1, 1]} : vector<2x384xf32> to vector<1x384xf32>
    %20 = arith.mulf %18, %19 : vector<1x384xf32>
    %21 = arith.subf %14, %11 : vector<2x384xf32>
    %22 = vector.extract_strided_slice %21 {offsets = [0, 0], sizes = [1, 384], strides = [1, 1]} : vector<2x384xf32> to vector<1x384xf32>
    %23 = vector.extract_strided_slice %21 {offsets = [1, 0], sizes = [1, 384], strides = [1, 1]} : vector<2x384xf32> to vector<1x384xf32>
    %cst_2 = arith.constant 0.000000e+00 : f32
    %24 = vector.broadcast %cst_2 : f32 to vector<1x384xf32>
    %25 = arith.cmpf ogt, %22, %24 : vector<1x384xf32>
    %cst_3 = arith.constant 0.000000e+00 : f32
    %26 = vector.broadcast %cst_3 : f32 to vector<1x384xf32>
    %27 = arith.cmpf ogt, %23, %26 : vector<1x384xf32>
    %28 = arith.andi %25, %27 : vector<1x384xi1>
    %29 = arith.mulf %22, %23 : vector<1x384xf32>
    %cst_4 = arith.constant 0.000000e+00 : f32
    %30 = vector.broadcast %cst_4 : f32 to vector<1x384xf32>
    %31 = arith.select %28, %29, %30 : vector<1x384xi1>, vector<1x384xf32>
    %32 = arith.addf %17, %20 : vector<1x384xf32>
    %33 = arith.subf %32, %31 : vector<1x384xf32>
    %cst_5 = arith.constant 1.000000e-16 : f32
    %34 = vector.broadcast %cst_5 : f32 to vector<1x384xf32>
    %35 = arith.addf %33, %34 : vector<1x384xf32>
    %36 = arith.divf %31, %35 : vector<1x384xf32>
    %37 = arith.mulf %36, %36 : vector<1x384xf32>
    %cst_6 = arith.constant 1.000000e+00 : f32
    %38 = vector.broadcast %cst_6 : f32 to vector<1x384xf32>
    %39 = arith.subf %38, %37 : vector<1x384xf32>
    %c0_7 = arith.constant 0 : index
    %c0_8 = arith.constant 0 : index
    %40 = vector.load %arg2[%c0_7, %c0_8] : memref<1x384xf32, #tpu.memory_space<vmem>>, vector<1x384xf32>
    tpu.vector_store %arg2[%c0_7, %c0_8], %39 {strides = array<i32>} : memref<1x384xf32, #tpu.memory_space<vmem>>, vector<1x384xf32>,
    return
  }
  func.func @transform_0(%arg0: i32) -> (i32, i32) {
    %c0_i32 = arith.constant 0 : i32
    %c0_i32_0 = arith.constant 0 : i32
    return %c0_i32, %arg0 : i32, i32
  }
  func.func @transform_1(%arg0: i32) -> (i32, i32) {
    %c0_i32 = arith.constant 0 : i32
    %c0_i32_0 = arith.constant 0 : i32
    return %c0_i32, %arg0 : i32, i32
  }
}

</mosaic_0001>

<bundles_post_ra>
// kernel: tpu_custom_call.1
= control target key start
LH: loop header
LB: loop body
LE: loop exit
PB: predicated region body
PF: predicated region fallthrough
CT: control target
= control target key end

     0   :  { %6 = vsyncpa [#allocation3], 0  ;;  %s327_s0 = inlined_call_operand.hbm [shape: f32[8,384], index: 0, kind: input, shape index: {}]   ;;  %s328_s1 = inlined_call_operand.hbm [shape: f32[1,384], index: 1, kind: output, shape index: {}]  }
   0x1   :  { %7 = vsyncpa [#allocation4], 0  ;;  %s13_s8 = sshll.u32 %s327_s0, 4  ;;  %s293_s9 = smov [#allocation2]   ;;  %s14_s8 = int_to_ptr.hbm [resolvable:$true] %s13_s8 }
   0x2   :  { %s15_s10 = sshll.u32 %s293_s9, 4  ;;  %s16_s10 = int_to_ptr.vmem [resolvable:$true] %s15_s10 }
   0x3   :  { %18 = dma.hbm_to_vmem [thread:$0]  %s14_s8, 384, %s16_s10, [#allocation3]  }
   0x4   :  { %289 = dma.done.wait [#allocation3], 384  }
   0x5   :  { %290 = vsyncadd [#allocation3], 4294966912  ;;  %v23_v0 = vld [vmem:[#allocation2] sm:$0xff]  ;;  %v24_v1 = vld [vmem:[#allocation2 + $0x8] sm:$0xff]  ;;  %v294_v40 = vmov 0   ;;  %s295_s0 = smov [#allocation5]  }
   0x6   :  { %v25_v2 = vld [vmem:[#allocation2 + $0x10] sm:$0xff]  ;;  %v26_v3 = vmul.f32 0.5, %v23_v0  ;;  %v27_v4 = vmul.f32 0.5, %v24_v1  ;;  %v71_v6 = vrot.slane %v23_v0, 1  ;;  %v72_v10 = vrot.slane %v24_v1, 1  ;;  %s220_s11 = sshll.u32 %s295_s0, 4  ;;  %s221_s11 = int_to_ptr.vmem [resolvable:$true] %s220_s11 }
   0x7   :  { %v28_v5 = vmul.f32 0.5, %v25_v2  ;;  %v73_v11 = vrot.slane %v25_v2, 1  ;;  %s222_s14 = sshll.u32 %s328_s1, 4  ;;  %s223_s14 = int_to_ptr.hbm [resolvable:$true] %s222_s14 }
   0x8   :  { %v32_v7 = vrot.slane %v26_v3, 2  ;;  %v33_v8 = vrot.slane %v27_v4, 2  ;;  %v77_v18 = vmul.f32 %v71_v6, %v23_v0  ;;  %v78_v25 = vmul.f32 %v72_v10, %v24_v1 }
   0x9   :  { %v34_v9 = vrot.slane %v28_v5, 2  ;;  %v79_v26 = vmul.f32 %v73_v11, %v25_v2 }
   0xa   :  { %v38_v12 = vsub.f32 %v23_v0, %v32_v7  ;;  %v39_v13 = vsub.f32 %v24_v1, %v33_v8  ;;  %v53_v15 = vadd.f32 %v32_v7, %v23_v0  ;;  %v54_v16 = vadd.f32 %v33_v8, %v24_v1 }
   0xb   :  { %v40_v14 = vsub.f32 %v25_v2, %v34_v9  ;;  %v55_v17 = vadd.f32 %v34_v9, %v25_v2  ;;  %v116_v36 = vrot.slane %v77_v18, 4  ;;  %v117_v38 = vrot.slane %v78_v25, 4 }
   0xc   :  { %v44_v19 = vrot.slane %v38_v12, 4  ;;  %v45_v20 = vrot.slane %v39_v13, 4  ;;  %v59_v22 = vrot.slane %v53_v15, 4  ;;  %v60_v23 = vrot.slane %v54_v16, 4 }
   0xd   :  { %v46_v21 = vrot.slane %v40_v14, 4  ;;  %v61_v24 = vrot.slane %v55_v17, 4  ;;  %v118_v39 = vrot.slane %v79_v26, 4  ;;  %v122_v52 = vadd.f32 %v116_v36, %v77_v18 }
   0xe   :  { %v50_v27 = vmax.f32 %v38_v12, %v44_v19  ;;  %v51_v28 = vmax.f32 %v39_v13, %v45_v20  ;;  %v65_v30 = vmin.f32 %v53_v15, %v59_v22  ;;  %v66_v31 = vmin.f32 %v54_v16, %v60_v23 }
   0xf   :  { %v52_v29 = vmax.f32 %v40_v14, %v46_v21  ;;  %v67_v32 = vmin.f32 %v55_v17, %v61_v24  ;;  %v123_v54 = vadd.f32 %v117_v38, %v78_v25  ;;  %v124_v56 = vadd.f32 %v118_v39, %v79_v26 }
  0x10   :  { %v80_v33 = vsub.f32 %v65_v30, %v50_v27  ;;  %v81_v34 = vsub.f32 %v66_v31, %v51_v28 }
  0x11   :  { %v82_v35 = vsub.f32 %v67_v32, %v52_v29 }
  0x12   :  { %vm83_vm0 = vcmp.gt.f32.partialorder %v80_v33, 0.0  ;;  %v101_v37 = vrot.slane %v80_v33, 1  ;;  %vm84_vm1 = vcmp.gt.f32.partialorder %v81_v34, 0.0  ;;  %v102_v42 = vrot.slane %v81_v34, 1 }
  0x13   :  { %vm85_vm2 = vcmp.gt.f32.partialorder %v82_v35, 0.0  ;;  %v86_v41 = vsel %vm83_vm0, 1, %v294_v40  ;;  %v87_v43 = vsel %vm84_vm1, 1, %v294_v40  ;;  %v103_v46 = vrot.slane %v82_v35, 1 }
  0x14   :  { %v88_v44 = vsel %vm85_vm2, 1, %v294_v40  ;;  %v89_v45 = vrot.slane %v86_v41, 1  ;;  %v90_v47 = vrot.slane %v87_v43, 1  ;;  %v107_v49 = vmul.f32 %v101_v37, %v80_v33 }
  0x15   :  { %v91_v48 = vrot.slane %v88_v44, 1  ;;  %v108_v50 = vmul.f32 %v102_v42, %v81_v34  ;;  %v109_v51 = vmul.f32 %v103_v46, %v82_v35  ;;  %v210_v43 = vlaneseq }
  0x16   :  { %vm92_vm3 = vcmp.ne.s32.totalorder %v89_v45, 0  ;;  %vm93_vm4 = vcmp.ne.s32.totalorder %v90_v47, 0 }
  0x17   :  { %vm94_vm5 = vcmp.ne.s32.totalorder %v91_v48, 0  ;;  %vm95_vm6 = vmand %vm83_vm0, %vm92_vm3 }
  0x18   :  { %vm96_vm7 = vmand %vm84_vm1, %vm93_vm4  ;;  %v110_v53 = vsel %vm95_vm6, %v107_v49, 0.0  ;;  %vm207_vm6 = vcmask 1041408  }
  0x19   :  { %vm97_vm8 = vmand %vm85_vm2, %vm94_vm5  ;;  %v111_v55 = vsel %vm96_vm7, %v108_v50, 0.0  ;;  %v128_v57 = vrot.slane %v110_v53, 6  ;;  %vm205_vm5 = vcmask 1040384   ;;  %vm212_vm7 = vcmp.lt.s32.totalorder %v210_v43, 384 }
  0x1a   :  { %v112_v58 = vsel %vm97_vm8, %v109_v51, 0.0  ;;  %v129_v59 = vrot.slane %v111_v55, 6 }
  0x1b   :  { %v130_v60 = vrot.slane %v112_v58, 6  ;;  %v134_v61 = vsub.f32 %v122_v52, %v128_v57 }
  0x1c   :  { %v135_v62 = vsub.f32 %v123_v54, %v129_v59 }
  0x1d   :  { %v136_v63 = vsub.f32 %v124_v56, %v130_v60  ;;  %v137_v0 = vadd.f32 1e-16, %v134_v61 }
  0x1e   :  { %v138_v1 = vadd.f32 1e-16, %v135_v62 }
  0x1f   :  { %v139_v2 = vadd.f32 1e-16, %v136_v63  ;;  %v143_v3 = vrot.slane %v137_v0, 2 }
  0x20   :  { %v144_v4 = vrot.slane %v138_v1, 2 }
  0x21   :  { %v145_v5 = vrot.slane %v139_v2, 2  ;;  %235 = vrcp.f32 %v143_v3  ;;  %vm154_vm9 = vweird.f32 %v143_v3  ;;  %v158_v9 = vand.u32 2147483647, %v143_v3 }
  0x22   :  { %237 = vrcp.f32 %v144_v4  ;;  %v160_v11 = vand.u32 2147483648, %v143_v3  ;;  %vm169_vm10 = vweird.f32 %v144_v4  ;;  %v173_v13 = vand.u32 2147483647, %v144_v4 }
  0x23   :  { %239 = vrcp.f32 %v145_v5  ;;  %v175_v15 = vand.u32 2147483648, %v144_v4  ;;  %vm184_vm13 = vweird.f32 %v145_v5  ;;  %v190_v18 = vand.u32 2147483648, %v145_v5 }
  0x24   :  { %v188_v21 = vand.u32 2147483647, %v145_v5  ;;  %v161_v23 = vor.u32 1.1754944e-38, %v160_v11  ;;  %vm159_vm0 = vcmp.eq.f32.partialorder %v158_v9, 8.507059e+37  ;;  %vm174_vm2 = vcmp.eq.f32.partialorder %v173_v13, 8.507059e+37 }
  0x25   :  { %v176_v26 = vor.u32 1.1754944e-38, %v175_v15  ;;  %v191_v29 = vor.u32 1.1754944e-38, %v190_v18 }
  0x26   :  { %vm189_vm4 = vcmp.eq.f32.partialorder %v188_v21, 8.507059e+37 }
  0x27   :  { %v236_v6 = vpop.eup %235 }
  0x28   :  { %v238_v7 = vpop.eup %237  ;;  %v150_v8 = vmul.f32 %v236_v6, %v143_v3  ;;  %vm155_vm11 = vweird.f32 %v236_v6 }
  0x29   :  { %v240_v10 = vpop.eup %239  ;;  %v165_v12 = vmul.f32 %v238_v7, %v144_v4  ;;  %vm170_vm12 = vweird.f32 %v238_v7  ;;  %vm316_vm15 = vmor %vm154_vm9, %vm155_vm11 }
  0x2a   :  { %v151_v14 = vsub.f32 1.0, %v150_v8  ;;  %v180_v16 = vmul.f32 %v240_v10, %v145_v5  ;;  %vm185_vm14 = vweird.f32 %v240_v10  ;;  %vm171_vm1 = vmor %vm169_vm10, %vm170_vm12 }
  0x2b   :  { %v166_v17 = vsub.f32 1.0, %v165_v12  ;;  %vm186_vm3 = vmor %vm184_vm13, %vm185_vm14 }
  0x2c   :  { %v152_v19 = vmul.f32 %v236_v6, %v151_v14  ;;  %v181_v20 = vsub.f32 1.0, %v180_v16 }
  0x2d   :  { %v167_v24 = vmul.f32 %v238_v7, %v166_v17 }
  0x2e   :  { %v153_v25 = vadd.f32 %v236_v6, %v152_v19  ;;  %v182_v27 = vmul.f32 %v240_v10, %v181_v20 }
  0x2f   :  { %v168_v28 = vadd.f32 %v238_v7, %v167_v24 }
  0x30   :  { %v157_v30 = vsel %vm316_vm15, %v236_v6, %v153_v25  ;;  %v183_v31 = vadd.f32 %v240_v10, %v182_v27 }
  0x31   :  { %v162_v32 = vsel %vm159_vm0, %v161_v23, %v157_v30  ;;  %v172_v33 = vsel %vm171_vm1, %v238_v7, %v168_v28 }
  0x32   :  { %v163_v34 = vmul.f32 %v162_v32, %v110_v53  ;;  %v177_v35 = vsel %vm174_vm2, %v176_v26, %v172_v33  ;;  %v187_v36 = vsel %vm186_vm3, %v240_v10, %v183_v31 }
  0x33   :  { %v178_v37 = vmul.f32 %v177_v35, %v111_v55  ;;  %v192_v38 = vsel %vm189_vm4, %v191_v29, %v187_v36 }
  0x34   :  { %v193_v39 = vmul.f32 %v192_v38, %v112_v58  ;;  %v194_v40 = vmul.f32 %v163_v34, %v163_v34 }
  0x35   :  { %v195_v41 = vmul.f32 %v178_v37, %v178_v37 }
  0x36   :  { %v196_v42 = vmul.f32 %v193_v39, %v193_v39  ;;  %v197_v44 = vsub.f32 1.0, %v194_v40 }
  0x37   :  { %v198_v45 = vsub.f32 1.0, %v195_v41 }
  0x38   :  { %v199_v46 = vsub.f32 1.0, %v196_v42 }
  0x39   :  { %v203_v47 = vrot.slane %v198_v45, 7 }
  0x3a   :  { %v204_v48 = vrot.slane %v199_v46, 6 }
  0x3b   :  { %v206_v49 = vsel %vm205_vm5, %v197_v44, %v203_v47 }
  0x3c   :  { %v208_v50 = vsel %vm207_vm6, %v206_v49, %v204_v48 }
  0x3d   :  { %214 = vst.msk [vmem:[#allocation5] sm:$0x7] %vm212_vm7, %v208_v50 }
  0x3e   :  { %225 = dma.vmem_to_hbm [thread:$0]  %s221_s11, 48, %s223_s14, [#allocation4]  }
  0x3f   :  { %291 = dma.done.wait [#allocation4], 48  }
  0x40   :  { %292 = vsyncadd [#allocation4], 4294967248 }
  0x41   :  { %230 = vsyncpa [#allocation3], 1 }
  0x42   :  { %231 = vsyncpa [#allocation4], 1 }

</bundles_post_ra>
